<compile_context>
chip_gen: v7x
topology: tpu7x:2x2x1
jax: 0.10.0
libtpu: 0.0.40
codegen_flags: <defaults>
</compile_context>

<pallas_src>
import functools

import jax
import jax.numpy as jnp
from jax.experimental import pallas as pl
from jax.experimental.pallas import tpu as pltpu


def _prenorm_drop_kernel(*refs, num_heads, tq, dropout_rate, use_dropout,
                         emit_weights, eps=1e-5):
    (x_ref, gamma_ref, beta_ref, wqkv_ref, bqkv_ref, wo_ref, bo_ref) = refs[:7]
    i = 7
    rnd_ref = None
    if use_dropout:
        rnd_ref = refs[i]; i += 1
    out_ref = refs[i]; i += 1
    attn_ref = None
    if emit_weights:
        attn_ref = refs[i]; i += 1
    q_scr, k_scr, v_scr, ctx_scr = refs[i:i + 4]

    qi = pl.program_id(1)
    S = x_ref.shape[1]
    D = x_ref.shape[2]
    H = num_heads
    hd = D // H
    scale = 1.0 / (hd ** 0.5)

    # ---- Once per batch element (qi == 0): LayerNorm over the full sequence and
    #      fused QKV projection; per-head bf16 Q/K/V stay resident in VMEM scratch
    #      across all query tiles of this batch element. --------------------------
    @pl.when(qi == 0)
    def _():
        x = x_ref[0]                                            # (S, D) f32
        mean = jnp.mean(x, axis=-1, keepdims=True)
        cen = x - mean
        var = jnp.mean(cen * cen, axis=-1, keepdims=True)
        xn = cen * jax.lax.rsqrt(var + eps)
        xn = xn * gamma_ref[...] + beta_ref[...]                # (S, D) f32
        # bf16 operands -> MXU native rate; f32 accumulation.
        qkv = jnp.dot(xn.astype(jnp.bfloat16), wqkv_ref[...],
                      preferred_element_type=jnp.float32) + bqkv_ref[...]
        for h in range(H):                                      # one-time head split
            q_scr[h] = (qkv[:, h * hd:(h + 1) * hd] * scale).astype(jnp.bfloat16)
            k_scr[h] = qkv[:, D + h * hd:D + (h + 1) * hd].astype(jnp.bfloat16)
            v_scr[h] = qkv[:, 2 * D + h * hd:2 * D + (h + 1) * hd].astype(jnp.bfloat16)

    # ---- Per query tile: batched-head attention over the resident K/V ----------
    q_t = q_scr[:, pl.ds(qi * tq, tq), :]                       # (H, TQ, hd) bf16
    scores = jnp.einsum('hqd,hkd->hqk', q_t, k_scr[...],
                        preferred_element_type=jnp.float32)     # (H, TQ, S) f32
    m = jnp.max(scores, axis=-1, keepdims=True)
    e = jnp.exp(scores - m)
    p = e / jnp.sum(e, axis=-1, keepdims=True)                  # softmax, f32
    if emit_weights:
        attn_ref[0] = p.astype(attn_ref.dtype)                  # only when requested

    ctx = jnp.einsum('hqk,hkd->hqd', p.astype(jnp.bfloat16), v_scr[...],
                     preferred_element_type=jnp.float32)        # (H, TQ, hd) f32
    # Reassemble heads into (TQ, D) so the output projection is one D-wide matmul.
    for h in range(H):
        ctx_scr[:, h * hd:(h + 1) * hd] = ctx[h].astype(jnp.bfloat16)
    out = jnp.dot(ctx_scr[...], wo_ref[...],
                  preferred_element_type=jnp.float32) + bo_ref[...]   # (TQ, D) f32

    # ---- Dropout: host-generated uniforms, compare + select, 1/(1-p) folded ----
    if use_dropout:
        keep = rnd_ref[0] >= dropout_rate
        out = jnp.where(keep, out * (1.0 / (1.0 - dropout_rate)), 0.0)

    out_ref[0] = out.astype(out_ref.dtype)


def prenorm_drop(x, params, *, num_heads, dropout_rate, dropout_key=None,
                 weights=False, training=True, q_block=128):
    """x: (B, S, D) float32. Returns dropout(fn(norm(x))) [, attention_weights]."""
    B, S, D = x.shape
    assert D % num_heads == 0
    hd = D // num_heads
    gamma, beta, wqkv, bqkv, wo, bo = params

    # Query tile: 128 rows when the sequence divides evenly, else whole sequence.
    tq = q_block if (S % q_block == 0 and S > q_block) else S
    nq = S // tq

    use_dropout = bool(training) and float(dropout_rate) > 0.0
    emit_weights = bool(weights)

    # Cast matmul weights to bf16 once in the wrapper (halves their VMEM footprint
    # and feeds the MXU at native rate).  Biases / LayerNorm params stay f32.
    args = [x, gamma, beta, wqkv.astype(jnp.bfloat16), bqkv,
            wo.astype(jnp.bfloat16), bo]
    in_specs = [
        pl.BlockSpec((1, S, D), lambda b, qi: (b, 0, 0)),     # full seq; fetched once per b
        pl.BlockSpec((1, D), lambda b, qi: (0, 0)),
        pl.BlockSpec((1, D), lambda b, qi: (0, 0)),
        pl.BlockSpec((D, 3 * D), lambda b, qi: (0, 0)),
        pl.BlockSpec((1, 3 * D), lambda b, qi: (0, 0)),
        pl.BlockSpec((D, D), lambda b, qi: (0, 0)),
        pl.BlockSpec((1, D), lambda b, qi: (0, 0)),
    ]
    if use_dropout:
        # NOTE: uniforms generated host-side so the kernel also lowers in
        # interpret/CPU mode (pltpu.prng_* has no lowering there); on a pure-TPU
        # deployment this could switch to pltpu.prng_random_bits to save the read.
        if dropout_key is None:
            dropout_key = jax.random.PRNGKey(0)
        rnd = jax.random.uniform(dropout_key, (B, S, D), jnp.float32)
        args.append(rnd)
        in_specs.append(pl.BlockSpec((1, tq, D), lambda b, qi: (b, qi, 0)))

    out_shapes = [jax.ShapeDtypeStruct((B, S, D), x.dtype)]
    out_specs = [pl.BlockSpec((1, tq, D), lambda b, qi: (b, qi, 0))]
    if emit_weights:
        out_shapes.append(jax.ShapeDtypeStruct((B, num_heads, S, S), jnp.float32))
        out_specs.append(
            pl.BlockSpec((1, num_heads, tq, S), lambda b, qi: (b, 0, qi, 0)))

    scratch_shapes = [
        pltpu.VMEM((num_heads, S, hd), jnp.bfloat16),   # Q (pre-scaled by 1/sqrt(hd))
        pltpu.VMEM((num_heads, S, hd), jnp.bfloat16),   # K (resident across q tiles)
        pltpu.VMEM((num_heads, S, hd), jnp.bfloat16),   # V (resident across q tiles)
        pltpu.VMEM((tq, D), jnp.bfloat16),              # per-tile context reassembly
    ]

    kernel = functools.partial(
        _prenorm_drop_kernel,
        num_heads=num_heads, tq=tq,
        dropout_rate=float(dropout_rate),
        use_dropout=use_dropout, emit_weights=emit_weights)

    grid_spec = pltpu.PrefetchScalarGridSpec(
        num_scalar_prefetch=0,
        grid=(B, nq),
        in_specs=in_specs,
        out_specs=out_specs,
        scratch_shapes=scratch_shapes)

    results = pl.pallas_call(
        kernel,
        out_shape=tuple(out_shapes),
        grid_spec=grid_spec,
        compiler_params=pltpu.CompilerParams(
            # batch axis parallel (v7x megacore); q axis serial (carries K/V scratch)
            dimension_semantics=("parallel", "arbitrary")),
    )(*args)

    if emit_weights:
        return results[0], results[1]
    return results[0]


def make_params(key, dim):
    """Deterministic parameter init (LayerNorm: ones/zeros, attention: small normal)."""
    k1, k2, k3, k4 = jax.random.split(key, 4)
    gamma = jnp.ones((1, dim), jnp.float32)
    beta = jnp.zeros((1, dim), jnp.float32)
    wqkv = jax.random.normal(k1, (dim, 3 * dim), jnp.float32) * 0.02
    bqkv = jax.random.normal(k2, (1, 3 * dim), jnp.float32) * 0.02
    wo = jax.random.normal(k3, (dim, dim), jnp.float32) * 0.02
    bo = jax.random.normal(k4, (1, dim), jnp.float32) * 0.02
    return gamma, beta, wqkv, bqkv, wo, bo


def prenorm_attn_reference(x, params, num_heads, eps=1e-5):
    """Pure-JAX f32 reference of norm -> multi-head self-attention (no dropout)."""
    gamma, beta, wqkv, bqkv, wo, bo = params
    B, S, D = x.shape
    hd = D // num_heads
    mean = jnp.mean(x, axis=-1, keepdims=True)
    var = jnp.mean((x - mean) ** 2, axis=-1, keepdims=True)
    xn = (x - mean) * jax.lax.rsqrt(var + eps) * gamma[0] + beta[0]
    qkv = jnp.einsum('bsd,de->bse', xn, wqkv) + bqkv[0]
    q, k, v = jnp.split(qkv, 3, axis=-1)
    heads = lambda t: t.reshape(B, S, num_heads, hd).transpose(0, 2, 1, 3)
    q = heads(q) * (1.0 / hd ** 0.5)
    k = heads(k)
    v = heads(v)
    p = jax.nn.softmax(jnp.einsum('bhqd,bhkd->bhqk', q, k), axis=-1)
    ctx = jnp.einsum('bhqk,bhkd->bhqd', p, v).transpose(0, 2, 1, 3).reshape(B, S, D)
    return jnp.einsum('bsd,de->bse', ctx, wo) + bo[0], p


if __name__ == "__main__":
    B, S, D, H = 2, 8, 32, 4
    dropout_rate = 0.1

    key = jax.random.PRNGKey(0)
    kx, kp, kd = jax.random.split(key, 3)
    x = jax.random.normal(kx, (B, S, D), jnp.float32)
    params = make_params(kp, D)

    # Eval mode + weights=True: check against the pure-JAX reference (bf16-matmul tolerance).
    out_eval, attn_eval = prenorm_drop(
        x, params, num_heads=H, dropout_rate=dropout_rate,
        weights=True, training=False)
    jax.block_until_ready((out_eval, attn_eval))
    ref_out, ref_attn = prenorm_attn_reference(x, params, H)
    assert out_eval.shape == (B, S, D)
    assert attn_eval.shape == (B, H, S, S)
    assert jnp.allclose(out_eval, ref_out, atol=5e-2, rtol=5e-2)
    assert jnp.allclose(attn_eval, ref_attn, atol=5e-2, rtol=5e-2)

    # Training mode + weights=False: dropout path, no attention-weights output.
    out_train = prenorm_drop(
        x, params, num_heads=H, dropout_rate=dropout_rate, dropout_key=kd,
        weights=False, training=True)
    jax.block_until_ready(out_train)
    assert out_train.shape == (B, S, D)
    assert int(jnp.sum(out_train == 0.0)) > 0   # some elements were dropped

    print("KERNEL_OK")
</pallas_src>

<mosaic_0001>
module attributes {stable_mosaic.version = 11 : i64} {
  func.func @_prenorm_drop_kernel(%arg0: i32, %arg1: i32, %arg2: memref<1x8x32xf32, #tpu.memory_space<vmem>>, %arg3: memref<1x32xf32, #tpu.memory_space<vmem>>, %arg4: memref<1x32xf32, #tpu.memory_space<vmem>>, %arg5: memref<32x96xbf16, #tpu.memory_space<vmem>>, %arg6: memref<1x96xf32, #tpu.memory_space<vmem>>, %arg7: memref<32x32xbf16, #tpu.memory_space<vmem>>, %arg8: memref<1x32xf32, #tpu.memory_space<vmem>>, %arg9: memref<1x8x32xf32, #tpu.memory_space<vmem>>, %arg10: memref<1x4x8x8xf32, #tpu.memory_space<vmem>>, %arg11: memref<4x8x8xbf16, #tpu.memory_space<vmem>>, %arg12: memref<4x8x8xbf16, #tpu.memory_space<vmem>>, %arg13: memref<4x8x8xbf16, #tpu.memory_space<vmem>>, %arg14: memref<8x32xbf16, #tpu.memory_space<vmem>>) attributes {dimension_semantics = [#tpu.dimension_semantics<parallel>, #tpu.dimension_semantics<arbitrary>], iteration_bounds = array<i64: 2, 1>, scalar_prefetch = 0 : i64, scratch_operands = 4 : i64, tpu.core_type = #tpu.core_type<tc>, window_params = [{transform_indices = @transform_0, window_bounds = array<i64: 1, 8, 32>}, {pipeline_mode = #tpu.pipeline_mode<synchronous>, transform_indices = @transform_1, window_bounds = array<i64: 1, 32>}, {pipeline_mode = #tpu.pipeline_mode<synchronous>, transform_indices = @transform_2, window_bounds = array<i64: 1, 32>}, {pipeline_mode = #tpu.pipeline_mode<synchronous>, transform_indices = @transform_3, window_bounds = array<i64: 32, 96>}, {pipeline_mode = #tpu.pipeline_mode<synchronous>, transform_indices = @transform_4, window_bounds = array<i64: 1, 96>}, {pipeline_mode = #tpu.pipeline_mode<synchronous>, transform_indices = @transform_5, window_bounds = array<i64: 32, 32>}, {pipeline_mode = #tpu.pipeline_mode<synchronous>, transform_indices = @transform_6, window_bounds = array<i64: 1, 32>}, {transform_indices = @transform_7, window_bounds = array<i64: 1, 8, 32>}, {transform_indices = @transform_8, window_bounds = array<i64: 1, 4, 8, 8>}]} {
    %c0_i32 = arith.constant 0 : i32
    %0 = arith.cmpi eq, %arg1, %c0_i32 : i32
    %1 = arith.extui %0 : i1 to i32
    %c0_i32_0 = arith.constant 0 : i32
    %2 = arith.cmpi ne, %1, %c0_i32_0 : i32
    scf.if %2 {
      %c0_30 = arith.constant 0 : index
      %c0_31 = arith.constant 0 : index
      %c0_32 = arith.constant 0 : index
      %48 = vector.load %arg2[%c0_30, %c0_31, %c0_32] : memref<1x8x32xf32, #tpu.memory_space<vmem>>, vector<1x8x32xf32>
      %49 = vector.shape_cast %48 : vector<1x8x32xf32> to vector<8x32xf32>
      %cst_33 = arith.constant dense<0.000000e+00> : vector<8xf32>
      %50 = vector.multi_reduction <add>, %49, %cst_33 [1] : vector<8x32xf32> to vector<8xf32>
      %51 = vector.shape_cast %50 : vector<8xf32> to vector<8x1xf32>
      %cst_34 = arith.constant 3.200000e+01 : f32
      %52 = vector.broadcast %cst_34 : f32 to vector<8x1xf32>
      %53 = arith.divf %51, %52 : vector<8x1xf32>
      %54 = vector.broadcast %53 : vector<8x1xf32> to vector<8x32xf32>
      %55 = arith.subf %49, %54 : vector<8x32xf32>
      %56 = arith.mulf %55, %55 : vector<8x32xf32>
      %cst_35 = arith.constant dense<0.000000e+00> : vector<8xf32>
      %57 = vector.multi_reduction <add>, %56, %cst_35 [1] : vector<8x32xf32> to vector<8xf32>
      %58 = vector.shape_cast %57 : vector<8xf32> to vector<8x1xf32>
      %cst_36 = arith.constant 3.200000e+01 : f32
      %59 = vector.broadcast %cst_36 : f32 to vector<8x1xf32>
      %60 = arith.divf %58, %59 : vector<8x1xf32>
      %cst_37 = arith.constant 9.99999974E-6 : f32
      %61 = vector.broadcast %cst_37 : f32 to vector<8x1xf32>
      %62 = arith.addf %60, %61 : vector<8x1xf32>
      %63 = math.rsqrt %62 : vector<8x1xf32>
      %64 = vector.broadcast %63 : vector<8x1xf32> to vector<8x32xf32>
      %65 = arith.mulf %55, %64 : vector<8x32xf32>
      %c0_38 = arith.constant 0 : index
      %c0_39 = arith.constant 0 : index
      %66 = vector.load %arg3[%c0_38, %c0_39] : memref<1x32xf32, #tpu.memory_space<vmem>>, vector<1x32xf32>
      %67 = vector.broadcast %66 : vector<1x32xf32> to vector<8x32xf32>
      %68 = arith.mulf %65, %67 : vector<8x32xf32>
      %c0_40 = arith.constant 0 : index
      %c0_41 = arith.constant 0 : index
      %69 = vector.load %arg4[%c0_40, %c0_41] : memref<1x32xf32, #tpu.memory_space<vmem>>, vector<1x32xf32>
      %70 = vector.broadcast %69 : vector<1x32xf32> to vector<8x32xf32>
      %71 = arith.addf %68, %70 : vector<8x32xf32>
      %72 = arith.truncf %71 : vector<8x32xf32> to vector<8x32xbf16>
      %c0_42 = arith.constant 0 : index
      %c0_43 = arith.constant 0 : index
      %73 = vector.load %arg5[%c0_42, %c0_43] : memref<32x96xbf16, #tpu.memory_space<vmem>>, vector<32x96xbf16>
      %cst_44 = arith.constant dense<0.000000e+00> : vector<8x96xf32>
      %74 = tpu.matmul %72, %73, %cst_44 {dimension_numbers = #tpu.dot_dimension_numbers<[1], [0], [0], [1], [0, 0, 1, 1], [], []>} : vector<8x32xbf16>, vector<32x96xbf16>, vector<8x96xf32> -> vector<8x96xf32>
      %c0_45 = arith.constant 0 : index
      %c0_46 = arith.constant 0 : index
      %75 = vector.load %arg6[%c0_45, %c0_46] : memref<1x96xf32, #tpu.memory_space<vmem>>, vector<1x96xf32>
      %76 = vector.broadcast %75 : vector<1x96xf32> to vector<8x96xf32>
      %77 = arith.addf %74, %76 : vector<8x96xf32>
      %78 = vector.extract_strided_slice %77 {offsets = [0, 0], sizes = [8, 8], strides = [1, 1]} : vector<8x96xf32> to vector<8x8xf32>
      %cst_47 = arith.constant 0.353553385 : f32
      %79 = vector.broadcast %cst_47 : f32 to vector<8x8xf32>
      %80 = arith.mulf %78, %79 : vector<8x8xf32>
      %81 = arith.truncf %80 : vector<8x8xf32> to vector<8x8xbf16>
      %c0_48 = arith.constant 0 : index
      %c0_49 = arith.constant 0 : index
      %c0_50 = arith.constant 0 : index
      %82 = vector.load %arg11[%c0_48, %c0_49, %c0_50] : memref<4x8x8xbf16, #tpu.memory_space<vmem>>, vector<1x8x8xbf16>
      %83 = vector.shape_cast %82 : vector<1x8x8xbf16> to vector<8x8xbf16>
      %84 = vector.shape_cast %81 : vector<8x8xbf16> to vector<1x8x8xbf16>
      tpu.vector_store %arg11[%c0_48, %c0_49, %c0_50], %84 {strides = array<i32>} : memref<4x8x8xbf16, #tpu.memory_space<vmem>>, vector<1x8x8xbf16>,
      %85 = vector.extract_strided_slice %77 {offsets = [0, 32], sizes = [8, 8], strides = [1, 1]} : vector<8x96xf32> to vector<8x8xf32>
      %86 = arith.truncf %85 : vector<8x8xf32> to vector<8x8xbf16>
      %c0_51 = arith.constant 0 : index
      %c0_52 = arith.constant 0 : index
      %c0_53 = arith.constant 0 : index
      %87 = vector.load %arg12[%c0_51, %c0_52, %c0_53] : memref<4x8x8xbf16, #tpu.memory_space<vmem>>, vector<1x8x8xbf16>
      %88 = vector.shape_cast %87 : vector<1x8x8xbf16> to vector<8x8xbf16>
      %89 = vector.shape_cast %86 : vector<8x8xbf16> to vector<1x8x8xbf16>
      tpu.vector_store %arg12[%c0_51, %c0_52, %c0_53], %89 {strides = array<i32>} : memref<4x8x8xbf16, #tpu.memory_space<vmem>>, vector<1x8x8xbf16>,
      %90 = vector.extract_strided_slice %77 {offsets = [0, 64], sizes = [8, 8], strides = [1, 1]} : vector<8x96xf32> to vector<8x8xf32>
      %91 = arith.truncf %90 : vector<8x8xf32> to vector<8x8xbf16>
      %c0_54 = arith.constant 0 : index
      %c0_55 = arith.constant 0 : index
      %c0_56 = arith.constant 0 : index
      %92 = vector.load %arg13[%c0_54, %c0_55, %c0_56] : memref<4x8x8xbf16, #tpu.memory_space<vmem>>, vector<1x8x8xbf16>
      %93 = vector.shape_cast %92 : vector<1x8x8xbf16> to vector<8x8xbf16>
      %94 = vector.shape_cast %91 : vector<8x8xbf16> to vector<1x8x8xbf16>
      tpu.vector_store %arg13[%c0_54, %c0_55, %c0_56], %94 {strides = array<i32>} : memref<4x8x8xbf16, #tpu.memory_space<vmem>>, vector<1x8x8xbf16>,
      %95 = vector.extract_strided_slice %77 {offsets = [0, 8], sizes = [8, 8], strides = [1, 1]} : vector<8x96xf32> to vector<8x8xf32>
      %cst_57 = arith.constant 0.353553385 : f32
      %96 = vector.broadcast %cst_57 : f32 to vector<8x8xf32>
      %97 = arith.mulf %95, %96 : vector<8x8xf32>
      %98 = arith.truncf %97 : vector<8x8xf32> to vector<8x8xbf16>
      %c1 = arith.constant 1 : index
      %c0_58 = arith.constant 0 : index
      %c0_59 = arith.constant 0 : index
      %99 = vector.load %arg11[%c1, %c0_58, %c0_59] : memref<4x8x8xbf16, #tpu.memory_space<vmem>>, vector<1x8x8xbf16>
      %100 = vector.shape_cast %99 : vector<1x8x8xbf16> to vector<8x8xbf16>
      %101 = vector.shape_cast %98 : vector<8x8xbf16> to vector<1x8x8xbf16>
      tpu.vector_store %arg11[%c1, %c0_58, %c0_59], %101 {strides = array<i32>} : memref<4x8x8xbf16, #tpu.memory_space<vmem>>, vector<1x8x8xbf16>,
      %102 = vector.extract_strided_slice %77 {offsets = [0, 40], sizes = [8, 8], strides = [1, 1]} : vector<8x96xf32> to vector<8x8xf32>
      %103 = arith.truncf %102 : vector<8x8xf32> to vector<8x8xbf16>
      %c1_60 = arith.constant 1 : index
      %c0_61 = arith.constant 0 : index
      %c0_62 = arith.constant 0 : index
      %104 = vector.load %arg12[%c1_60, %c0_61, %c0_62] : memref<4x8x8xbf16, #tpu.memory_space<vmem>>, vector<1x8x8xbf16>
      %105 = vector.shape_cast %104 : vector<1x8x8xbf16> to vector<8x8xbf16>
      %106 = vector.shape_cast %103 : vector<8x8xbf16> to vector<1x8x8xbf16>
      tpu.vector_store %arg12[%c1_60, %c0_61, %c0_62], %106 {strides = array<i32>} : memref<4x8x8xbf16, #tpu.memory_space<vmem>>, vector<1x8x8xbf16>,
      %107 = vector.extract_strided_slice %77 {offsets = [0, 72], sizes = [8, 8], strides = [1, 1]} : vector<8x96xf32> to vector<8x8xf32>
      %108 = arith.truncf %107 : vector<8x8xf32> to vector<8x8xbf16>
      %c1_63 = arith.constant 1 : index
      %c0_64 = arith.constant 0 : index
      %c0_65 = arith.constant 0 : index
      %109 = vector.load %arg13[%c1_63, %c0_64, %c0_65] : memref<4x8x8xbf16, #tpu.memory_space<vmem>>, vector<1x8x8xbf16>
      %110 = vector.shape_cast %109 : vector<1x8x8xbf16> to vector<8x8xbf16>
      %111 = vector.shape_cast %108 : vector<8x8xbf16> to vector<1x8x8xbf16>
      tpu.vector_store %arg13[%c1_63, %c0_64, %c0_65], %111 {strides = array<i32>} : memref<4x8x8xbf16, #tpu.memory_space<vmem>>, vector<1x8x8xbf16>,
      %112 = vector.extract_strided_slice %77 {offsets = [0, 16], sizes = [8, 8], strides = [1, 1]} : vector<8x96xf32> to vector<8x8xf32>
      %cst_66 = arith.constant 0.353553385 : f32
      %113 = vector.broadcast %cst_66 : f32 to vector<8x8xf32>
      %114 = arith.mulf %112, %113 : vector<8x8xf32>
      %115 = arith.truncf %114 : vector<8x8xf32> to vector<8x8xbf16>
      %c2 = arith.constant 2 : index
      %c0_67 = arith.constant 0 : index
      %c0_68 = arith.constant 0 : index
      %116 = vector.load %arg11[%c2, %c0_67, %c0_68] : memref<4x8x8xbf16, #tpu.memory_space<vmem>>, vector<1x8x8xbf16>
      %117 = vector.shape_cast %116 : vector<1x8x8xbf16> to vector<8x8xbf16>
      %118 = vector.shape_cast %115 : vector<8x8xbf16> to vector<1x8x8xbf16>
      tpu.vector_store %arg11[%c2, %c0_67, %c0_68], %118 {strides = array<i32>} : memref<4x8x8xbf16, #tpu.memory_space<vmem>>, vector<1x8x8xbf16>,
      %119 = vector.extract_strided_slice %77 {offsets = [0, 48], sizes = [8, 8], strides = [1, 1]} : vector<8x96xf32> to vector<8x8xf32>
      %120 = arith.truncf %119 : vector<8x8xf32> to vector<8x8xbf16>
      %c2_69 = arith.constant 2 : index
      %c0_70 = arith.constant 0 : index
      %c0_71 = arith.constant 0 : index
      %121 = vector.load %arg12[%c2_69, %c0_70, %c0_71] : memref<4x8x8xbf16, #tpu.memory_space<vmem>>, vector<1x8x8xbf16>
      %122 = vector.shape_cast %121 : vector<1x8x8xbf16> to vector<8x8xbf16>
      %123 = vector.shape_cast %120 : vector<8x8xbf16> to vector<1x8x8xbf16>
      tpu.vector_store %arg12[%c2_69, %c0_70, %c0_71], %123 {strides = array<i32>} : memref<4x8x8xbf16, #tpu.memory_space<vmem>>, vector<1x8x8xbf16>,
      %124 = vector.extract_strided_slice %77 {offsets = [0, 80], sizes = [8, 8], strides = [1, 1]} : vector<8x96xf32> to vector<8x8xf32>
      %125 = arith.truncf %124 : vector<8x8xf32> to vector<8x8xbf16>
      %c2_72 = arith.constant 2 : index
      %c0_73 = arith.constant 0 : index
      %c0_74 = arith.constant 0 : index
      %126 = vector.load %arg13[%c2_72, %c0_73, %c0_74] : memref<4x8x8xbf16, #tpu.memory_space<vmem>>, vector<1x8x8xbf16>
      %127 = vector.shape_cast %126 : vector<1x8x8xbf16> to vector<8x8xbf16>
      %128 = vector.shape_cast %125 : vector<8x8xbf16> to vector<1x8x8xbf16>
      tpu.vector_store %arg13[%c2_72, %c0_73, %c0_74], %128 {strides = array<i32>} : memref<4x8x8xbf16, #tpu.memory_space<vmem>>, vector<1x8x8xbf16>,
      %129 = vector.extract_strided_slice %77 {offsets = [0, 24], sizes = [8, 8], strides = [1, 1]} : vector<8x96xf32> to vector<8x8xf32>
      %cst_75 = arith.constant 0.353553385 : f32
      %130 = vector.broadcast %cst_75 : f32 to vector<8x8xf32>
      %131 = arith.mulf %129, %130 : vector<8x8xf32>
      %132 = arith.truncf %131 : vector<8x8xf32> to vector<8x8xbf16>
      %c3 = arith.constant 3 : index
      %c0_76 = arith.constant 0 : index
      %c0_77 = arith.constant 0 : index
      %133 = vector.load %arg11[%c3, %c0_76, %c0_77] : memref<4x8x8xbf16, #tpu.memory_space<vmem>>, vector<1x8x8xbf16>
      %134 = vector.shape_cast %133 : vector<1x8x8xbf16> to vector<8x8xbf16>
      %135 = vector.shape_cast %132 : vector<8x8xbf16> to vector<1x8x8xbf16>
      tpu.vector_store %arg11[%c3, %c0_76, %c0_77], %135 {strides = array<i32>} : memref<4x8x8xbf16, #tpu.memory_space<vmem>>, vector<1x8x8xbf16>,
      %136 = vector.extract_strided_slice %77 {offsets = [0, 56], sizes = [8, 8], strides = [1, 1]} : vector<8x96xf32> to vector<8x8xf32>
      %137 = arith.truncf %136 : vector<8x8xf32> to vector<8x8xbf16>
      %c3_78 = arith.constant 3 : index
      %c0_79 = arith.constant 0 : index
      %c0_80 = arith.constant 0 : index
      %138 = vector.load %arg12[%c3_78, %c0_79, %c0_80] : memref<4x8x8xbf16, #tpu.memory_space<vmem>>, vector<1x8x8xbf16>
      %139 = vector.shape_cast %138 : vector<1x8x8xbf16> to vector<8x8xbf16>
      %140 = vector.shape_cast %137 : vector<8x8xbf16> to vector<1x8x8xbf16>
      tpu.vector_store %arg12[%c3_78, %c0_79, %c0_80], %140 {strides = array<i32>} : memref<4x8x8xbf16, #tpu.memory_space<vmem>>, vector<1x8x8xbf16>,
      %141 = vector.extract_strided_slice %77 {offsets = [0, 88], sizes = [8, 8], strides = [1, 1]} : vector<8x96xf32> to vector<8x8xf32>
      %142 = arith.truncf %141 : vector<8x8xf32> to vector<8x8xbf16>
      %c3_81 = arith.constant 3 : index
      %c0_82 = arith.constant 0 : index
      %c0_83 = arith.constant 0 : index
      %143 = vector.load %arg13[%c3_81, %c0_82, %c0_83] : memref<4x8x8xbf16, #tpu.memory_space<vmem>>, vector<1x8x8xbf16>
      %144 = vector.shape_cast %143 : vector<1x8x8xbf16> to vector<8x8xbf16>
      %145 = vector.shape_cast %142 : vector<8x8xbf16> to vector<1x8x8xbf16>
      tpu.vector_store %arg13[%c3_81, %c0_82, %c0_83], %145 {strides = array<i32>} : memref<4x8x8xbf16, #tpu.memory_space<vmem>>, vector<1x8x8xbf16>,
    } else {
    }
    %c8_i32 = arith.constant 8 : i32
    %3 = arith.muli %arg1, %c8_i32 : i32
    %c0 = arith.constant 0 : index
    %4 = arith.index_cast %3 : i32 to index
    %c0_1 = arith.constant 0 : index
    %5 = vector.load %arg11[%c0, %4, %c0_1] : memref<4x8x8xbf16, #tpu.memory_space<vmem>>, vector<4x8x8xbf16>
    %c0_2 = arith.constant 0 : index
    %c0_3 = arith.constant 0 : index
    %c0_4 = arith.constant 0 : index
    %6 = vector.load %arg12[%c0_2, %c0_3, %c0_4] : memref<4x8x8xbf16, #tpu.memory_space<vmem>>, vector<4x8x8xbf16>
    "tpu.trace_start"() <{level = 10 : i32, message = "hqd,hkd->hqk"}> : () -> ()
    %cst = arith.constant dense<0.000000e+00> : vector<4x8x8xf32>
    %7 = tpu.matmul %5, %6, %cst {dimension_numbers = #tpu.dot_dimension_numbers<[2], [2], [1], [1], [0, 0, 0, 1, 1, 1], [0], [0]>} : vector<4x8x8xbf16>, vector<4x8x8xbf16>, vector<4x8x8xf32> -> vector<4x8x8xf32>
    "tpu.trace_stop"() : () -> ()
    %cst_5 = arith.constant dense<0xFF800000> : vector<4x8xf32>
    %8 = vector.multi_reduction <maximumf>, %7, %cst_5 [2] : vector<4x8x8xf32> to vector<4x8xf32>
    %9 = vector.shape_cast %8 : vector<4x8xf32> to vector<4x8x1xf32>
    %10 = vector.broadcast %9 : vector<4x8x1xf32> to vector<4x8x8xf32>
    %11 = arith.subf %7, %10 : vector<4x8x8xf32>
    %12 = math.exp %11 : vector<4x8x8xf32>
    %cst_6 = arith.constant dense<0.000000e+00> : vector<4x8xf32>
    %13 = vector.multi_reduction <add>, %12, %cst_6 [2] : vector<4x8x8xf32> to vector<4x8xf32>
    %14 = vector.shape_cast %13 : vector<4x8xf32> to vector<4x8x1xf32>
    %15 = vector.broadcast %14 : vector<4x8x1xf32> to vector<4x8x8xf32>
    %16 = arith.divf %12, %15 : vector<4x8x8xf32>
    %c0_7 = arith.constant 0 : index
    %c0_8 = arith.constant 0 : index
    %c0_9 = arith.constant 0 : index
    %c0_10 = arith.constant 0 : index
    %17 = vector.load %arg10[%c0_7, %c0_8, %c0_9, %c0_10] : memref<1x4x8x8xf32, #tpu.memory_space<vmem>>, vector<1x4x8x8xf32>
    %18 = vector.shape_cast %17 : vector<1x4x8x8xf32> to vector<4x8x8xf32>
    %19 = vector.shape_cast %16 : vector<4x8x8xf32> to vector<1x4x8x8xf32>
    tpu.vector_store %arg10[%c0_7, %c0_8, %c0_9, %c0_10], %19 {strides = array<i32>} : memref<1x4x8x8xf32, #tpu.memory_space<vmem>>, vector<1x4x8x8xf32>,
    %20 = arith.truncf %16 : vector<4x8x8xf32> to vector<4x8x8xbf16>
    %c0_11 = arith.constant 0 : index
    %c0_12 = arith.constant 0 : index
    %c0_13 = arith.constant 0 : index
    %21 = vector.load %arg13[%c0_11, %c0_12, %c0_13] : memref<4x8x8xbf16, #tpu.memory_space<vmem>>, vector<4x8x8xbf16>
    "tpu.trace_start"() <{level = 10 : i32, message = "hqk,hkd->hqd"}> : () -> ()
    %cst_14 = arith.constant dense<0.000000e+00> : vector<4x8x8xf32>
    %22 = tpu.matmul %20, %21, %cst_14 {dimension_numbers = #tpu.dot_dimension_numbers<[2], [1], [1], [2], [0, 0, 0, 1, 1, 2], [0], [0]>} : vector<4x8x8xbf16>, vector<4x8x8xbf16>, vector<4x8x8xf32> -> vector<4x8x8xf32>
    "tpu.trace_stop"() : () -> ()
    %23 = vector.extract_strided_slice %22 {offsets = [0, 0, 0], sizes = [1, 8, 8], strides = [1, 1, 1]} : vector<4x8x8xf32> to vector<1x8x8xf32>
    %24 = vector.shape_cast %23 : vector<1x8x8xf32> to vector<8x8xf32>
    %25 = arith.truncf %24 : vector<8x8xf32> to vector<8x8xbf16>
    %c0_15 = arith.constant 0 : index
    %c0_16 = arith.constant 0 : index
    %26 = vector.load %arg14[%c0_15, %c0_16] : memref<8x32xbf16, #tpu.memory_space<vmem>>, vector<8x8xbf16>
    tpu.vector_store %arg14[%c0_15, %c0_16], %25 {strides = array<i32>} : memref<8x32xbf16, #tpu.memory_space<vmem>>, vector<8x8xbf16>,
    %27 = vector.extract_strided_slice %22 {offsets = [1, 0, 0], sizes = [1, 8, 8], strides = [1, 1, 1]} : vector<4x8x8xf32> to vector<1x8x8xf32>
    %28 = vector.shape_cast %27 : vector<1x8x8xf32> to vector<8x8xf32>
    %29 = arith.truncf %28 : vector<8x8xf32> to vector<8x8xbf16>
    %c0_17 = arith.constant 0 : index
    %c8 = arith.constant 8 : index
    %30 = vector.load %arg14[%c0_17, %c8] : memref<8x32xbf16, #tpu.memory_space<vmem>>, vector<8x8xbf16>
    tpu.vector_store %arg14[%c0_17, %c8], %29 {strides = array<i32>} : memref<8x32xbf16, #tpu.memory_space<vmem>>, vector<8x8xbf16>,
    %31 = vector.extract_strided_slice %22 {offsets = [2, 0, 0], sizes = [1, 8, 8], strides = [1, 1, 1]} : vector<4x8x8xf32> to vector<1x8x8xf32>
    %32 = vector.shape_cast %31 : vector<1x8x8xf32> to vector<8x8xf32>
    %33 = arith.truncf %32 : vector<8x8xf32> to vector<8x8xbf16>
    %c0_18 = arith.constant 0 : index
    %c16 = arith.constant 16 : index
    %34 = vector.load %arg14[%c0_18, %c16] : memref<8x32xbf16, #tpu.memory_space<vmem>>, vector<8x8xbf16>
    tpu.vector_store %arg14[%c0_18, %c16], %33 {strides = array<i32>} : memref<8x32xbf16, #tpu.memory_space<vmem>>, vector<8x8xbf16>,
    %35 = vector.extract_strided_slice %22 {offsets = [3, 0, 0], sizes = [1, 8, 8], strides = [1, 1, 1]} : vector<4x8x8xf32> to vector<1x8x8xf32>
    %36 = vector.shape_cast %35 : vector<1x8x8xf32> to vector<8x8xf32>
    %37 = arith.truncf %36 : vector<8x8xf32> to vector<8x8xbf16>
    %c0_19 = arith.constant 0 : index
    %c24 = arith.constant 24 : index
    %38 = vector.load %arg14[%c0_19, %c24] : memref<8x32xbf16, #tpu.memory_space<vmem>>, vector<8x8xbf16>
    tpu.vector_store %arg14[%c0_19, %c24], %37 {strides = array<i32>} : memref<8x32xbf16, #tpu.memory_space<vmem>>, vector<8x8xbf16>,
    %c0_20 = arith.constant 0 : index
    %c0_21 = arith.constant 0 : index
    %39 = vector.load %arg14[%c0_20, %c0_21] : memref<8x32xbf16, #tpu.memory_space<vmem>>, vector<8x32xbf16>
    %c0_22 = arith.constant 0 : index
    %c0_23 = arith.constant 0 : index
    %40 = vector.load %arg7[%c0_22, %c0_23] : memref<32x32xbf16, #tpu.memory_space<vmem>>, vector<32x32xbf16>
    %cst_24 = arith.constant dense<0.000000e+00> : vector<8x32xf32>
    %41 = tpu.matmul %39, %40, %cst_24 {dimension_numbers = #tpu.dot_dimension_numbers<[1], [0], [0], [1], [0, 0, 1, 1], [], []>} : vector<8x32xbf16>, vector<32x32xbf16>, vector<8x32xf32> -> vector<8x32xf32>
    %c0_25 = arith.constant 0 : index
    %c0_26 = arith.constant 0 : index
    %42 = vector.load %arg8[%c0_25, %c0_26] : memref<1x32xf32, #tpu.memory_space<vmem>>, vector<1x32xf32>
    %43 = vector.broadcast %42 : vector<1x32xf32> to vector<8x32xf32>
    %44 = arith.addf %41, %43 : vector<8x32xf32>
    %c0_27 = arith.constant 0 : index
    %c0_28 = arith.constant 0 : index
    %c0_29 = arith.constant 0 : index
    %45 = vector.load %arg9[%c0_27, %c0_28, %c0_29] : memref<1x8x32xf32, #tpu.memory_space<vmem>>, vector<1x8x32xf32>
    %46 = vector.shape_cast %45 : vector<1x8x32xf32> to vector<8x32xf32>
    %47 = vector.shape_cast %44 : vector<8x32xf32> to vector<1x8x32xf32>
    tpu.vector_store %arg9[%c0_27, %c0_28, %c0_29], %47 {strides = array<i32>} : memref<1x8x32xf32, #tpu.memory_space<vmem>>, vector<1x8x32xf32>,
    return
  }
  func.func @transform_0(%arg0: i32, %arg1: i32) -> (i32, i32, i32) {
    %c0_i32 = arith.constant 0 : i32
    %c0_i32_0 = arith.constant 0 : i32
    %c0_i32_1 = arith.constant 0 : i32
    return %arg0, %c0_i32, %c0_i32_0 : i32, i32, i32
  }
  func.func @transform_1(%arg0: i32, %arg1: i32) -> (i32, i32) {
    %c0_i32 = arith.constant 0 : i32
    %c0_i32_0 = arith.constant 0 : i32
    %c0_i32_1 = arith.constant 0 : i32
    return %c0_i32, %c0_i32_0 : i32, i32
  }
  func.func @transform_2(%arg0: i32, %arg1: i32) -> (i32, i32) {
    %c0_i32 = arith.constant 0 : i32
    %c0_i32_0 = arith.constant 0 : i32
    %c0_i32_1 = arith.constant 0 : i32
    return %c0_i32, %c0_i32_0 : i32, i32
  }
  func.func @transform_3(%arg0: i32, %arg1: i32) -> (i32, i32) {
    %c0_i32 = arith.constant 0 : i32
    %c0_i32_0 = arith.constant 0 : i32
    %c0_i32_1 = arith.constant 0 : i32
    return %c0_i32, %c0_i32_0 : i32, i32
  }
  func.func @transform_4(%arg0: i32, %arg1: i32) -> (i32, i32) {
    %c0_i32 = arith.constant 0 : i32
    %c0_i32_0 = arith.constant 0 : i32
    %c0_i32_1 = arith.constant 0 : i32
    return %c0_i32, %c0_i32_0 : i32, i32
  }
  func.func @transform_5(%arg0: i32, %arg1: i32) -> (i32, i32) {
    %c0_i32 = arith.constant 0 : i32
    %c0_i32_0 = arith.constant 0 : i32
    %c0_i32_1 = arith.constant 0 : i32
    return %c0_i32, %c0_i32_0 : i32, i32
  }
  func.func @transform_6(%arg0: i32, %arg1: i32) -> (i32, i32) {
    %c0_i32 = arith.constant 0 : i32
    %c0_i32_0 = arith.constant 0 : i32
    %c0_i32_1 = arith.constant 0 : i32
    return %c0_i32, %c0_i32_0 : i32, i32
  }
  func.func @transform_7(%arg0: i32, %arg1: i32) -> (i32, i32, i32) {
    %c0_i32 = arith.constant 0 : i32
    %c0_i32_0 = arith.constant 0 : i32
    return %arg0, %arg1, %c0_i32 : i32, i32, i32
  }
  func.func @transform_8(%arg0: i32, %arg1: i32) -> (i32, i32, i32, i32) {
    %c0_i32 = arith.constant 0 : i32
    %c0_i32_0 = arith.constant 0 : i32
    %c0_i32_1 = arith.constant 0 : i32
    return %arg0, %c0_i32, %arg1, %c0_i32_0 : i32, i32, i32, i32
  }
}

</mosaic_0001>

<bundles_post_ra>
// kernel: tpu_custom_call.1
= control target key start
LH: loop header
LB: loop body
LE: loop exit
PB: predicated region body
PF: predicated region fallthrough
CT: control target
= control target key end

     0   :  { %s2192_s0 = inlined_call_operand.hbm [shape: f32[2,8,32], index: 0, kind: input, shape index: {}]   ;;  %s2193_s1 = inlined_call_operand.vmem [shape: f32[1,32], index: 1, kind: input, shape index: {}]   ;;  %s2194_s2 = inlined_call_operand.vmem [shape: f32[1,32], index: 2, kind: input, shape index: {}]   ;;  %s2195_s3 = inlined_call_operand.hbm [shape: bf16[32,96], index: 3, kind: input, shape index: {}]   ;;  %s2196_s4 = inlined_call_operand.hbm [shape: f32[1,96], index: 4, kind: input, shape index: {}]   ;;  %s2197_s5 = inlined_call_operand.vmem [shape: bf16[32,32], index: 5, kind: input, shape index: {}]   ;;  %s2198_s6 = inlined_call_operand.vmem [shape: f32[1,32], index: 6, kind: input, shape index: {}]   ;;  %s2199_s7 = inlined_call_operand.hbm [shape: f32[2,8,32], index: 7, kind: output, shape index: {0}]   ;;  %s2200_s8 = inlined_call_operand.hbm [shape: f32[2,4,8,8], index: 8, kind: output, shape index: {1}]  }
   0x1   :  { %2208 = sst [smem:[#allocation21_spill]] %s2192_s0 }
   0x2   :  { %2209 = sst [smem:[#allocation22_spill]] %s2199_s7 }
   0x3   :  { %14 = vsyncpa [#allocation7], 0 }
   0x4   :  { %16 = vsyncpa [#allocation7 + $0x1], 0 }
   0x5   :  { %17 = vsyncpa [#allocation10], 0 }
   0x6   :  { %18 = vsyncpa [#allocation8], 0 }
   0x7   :  { %20 = vsyncpa [#allocation8 + $0x1], 0 }
   0x8   :  { %21 = vsyncpa [#allocation14], 0 }
   0x9   :  { %23 = vsyncpa [#allocation14 + $0x1], 0  ;;  %s1792_s27 = smov 0   ;;  %s1794_s28 = smov 0  }
   0xa   :  { %s1796_s29 = smov 0   ;;  %s1798_s30 = smov 0  }
   0xb   :  { %s1800_s9 = smov 0   ;;  %s1802_s10 = smov 0  }
   0xc LB: > { %2210 = sst [smem:[#allocation19_spill]] %s1701_s27  ;;  %s1252_s11 = sadd.s32 4294967295, %s1721_s10   ;;  %s1721_s10 = sphi %s1802_s10, %s29_s10   ;;  %s1717_s9 = sphi %s1800_s9, %s2233_s9   ;;  %s1713_s30 = sphi %s1798_s30, %s2232_s30   ;;  %s1709_s29 = sphi %s1796_s29, %s2231_s29   ;;  %s1705_s28 = sphi %s1794_s28, %s2230_s28   ;;  %s1701_s27 = sphi %s1792_s27, %s2229_s27  }
   0xd   : > { %s1253_s12 = sadd.s32 4294967294, %s1721_s10   ;;  %p61_p0 = scmp.ne.s32.totalorder %s1705_s28, %s1701_s27 }
   0xe   : > { %p1826_p1 = scmp.eq.s32.totalorder %s1252_s11, 0  ;;  %p1830_p2 = scmp.eq.s32.totalorder %s1252_s11, 1 }
   0xf   : > { %p219_p3 = scmp.eq.s32.totalorder %s1253_s12, 1  ;;  %p1254_p5 = scmp.ge.s32.totalorder %s1721_s10, 1 }
  0x10   : > { %s2211_s13 = scalar_select %p1826_p1, 1, 0 }
  0x11   : > { %p1836_p4 = por %p1826_p1, %p61_p0  ;;  %p1841_p6 = por %p219_p3, %p61_p0 }
  0x12   : > { %p254_p7 = scmp.lt.s32.totalorder %s1721_s10, 3  ;;  %s1723_s18 = smov [#allocation9]  }
  0x13   : > { %s2213_s15 = scalar_select %p1836_p4, 1, 0 }
  0x14   : > { %s2214_s16 = scalar_select %p1841_p6, 1, 0 }
  0x15   : > { %p1846_p8 = pnand %p1254_p5, %p254_p7  ;;  %s272_s19 = sshll.u32 %s1723_s18, 4  ;;  %s1850_s19 = int_to_ptr.vmem [resolvable:$true] %s272_s19 }
  0x16   : > { %2215 = sst [smem:[#allocation20_spill]] %s2214_s16  ;;  %s1724_s21 = smov [#allocation11]  }
  0x17   : > { %p1402_p9 = pneg %p1846_p8  ;;  %s286_s22 = sshll.u32 %s1724_s21, 4  ;;  %s1861_s22 = int_to_ptr.vmem [resolvable:$true] %s286_s22 }
  0x18   : > { %s1517_s25 = scalar_lea.hbm %s2195_s3, 256 }
  0x19   : > { %p1857_p11 = pnand %p1402_p9, %p1826_p1  ;;  %p1518_p12 = scmp.ne.s32.totalorder %s2195_s3, %s1517_s25 }
  0x1a   : > { %p1524_p5 = scmp.lt.u32.totalorder %s1517_s25, %s2195_s3 }
  0x1b   : > { %p1519_p13 = pneg %p1857_p11 }
  0x1d   : > { %p1520_p0 = pnand %p1519_p13, %p1518_p12 }
  0x1f   : > { %p1521_p3 = pneg %p1520_p0 }
  0x21   : > { %p1526_p7 = pnand %p1524_p5, %p1521_p3 }
  0x23   : > { %1529 = shalt.err (!%p1526_p7)
}
  0x24   : > { %s1530_s21 = scalar_lea.vmem %s1850_s19, 256  ;;  %p1538_p1 = scmp.lt.s32.totalorder %s1850_s19, %s1850_s19 }
  0x25   : > { %p1531_p9 = scmp.ne.s32.totalorder %s1850_s19, %s1530_s21  ;;  %p1539_p12 = scmp.lt.s32.totalorder %s1530_s21, %s1530_s21 }
  0x27   : > { %p1533_p10 = pnand %p1531_p9, %p1519_p13  ;;  %p1540_p0 = por %p1539_p12, %p1538_p1 }
  0x29   : > { %p1534_p6 = pneg %p1533_p10 }
  0x2b   : > { %p1541_p4 = pnand %p1540_p0, %p1534_p6 }
  0x2d   : > { %1544 = shalt.err (!%p1541_p4)
}
  0x2e   : > { %s1725_s23 = smov 64   ;;  %s1726_s24 = smov 4  }
  0x2f   : > { %1405 = dma.hbm_to_vmem [thread:$0]  (!%p1857_p11), %s2195_s3, 256, %s1850_s19, [#allocation10], %s1725_s23, %s1725_s23, %s1726_s24  }
  0x30   : > { %s1545_s18 = scalar_lea.hbm %s2196_s4, 16 }
  0x31   : > { %p1546_p1 = scmp.ne.s32.totalorder %s2196_s4, %s1545_s18  ;;  %p1552_p10 = scmp.lt.u32.totalorder %s1545_s18, %s2196_s4 }
  0x33   : > { %p1548_p4 = pnand %p1546_p1, %p1519_p13 }
  0x35   : > { %p1549_p6 = pneg %p1548_p4 }
  0x37   : > { %p1554_p3 = pnand %p1552_p10, %p1549_p6 }
  0x39   : > { %1557 = shalt.err (!%p1554_p3)
}
  0x3a   : > { %s1558_s19 = scalar_lea.vmem %s1861_s22, 16  ;;  %s1565_s27 = scalar_lea.vmem %s1861_s22, 32 }
  0x3b   : > { %p1559_p5 = scmp.ne.s32.totalorder %s1861_s22, %s1558_s19  ;;  %p1566_p12 = scmp.lt.s32.totalorder %s1861_s22, %s1861_s22 }
  0x3c   : > { %p1567_p0 = scmp.lt.s32.totalorder %s1565_s27, %s1558_s19 }
  0x3d   : > { %p1561_p7 = pnand %p1559_p5, %p1519_p13 }
  0x3e   : > { %p1568_p1 = por %p1567_p0, %p1566_p12 }
  0x3f   : > { %p1562_p9 = pneg %p1561_p7 }
  0x41   : > { %p1569_p4 = pnand %p1568_p1, %p1562_p9 }
  0x43   : > { %1572 = shalt.err (!%p1569_p4)
}
  0x44   : > { %1408 = dma.hbm_to_vmem [thread:$0]  (!%p1857_p11), %s2196_s4, 16, %s1861_s22, [#allocation10]  }
  0x45   : > { %s41_s23 = sadd.s32 1, %s1717_s9  ;;  %s48_s24 = sadd.s32 1, %s1709_s29 }
  0x46   : > { %p43_p13 = scmp.ge.s32.totalorder %s41_s23, 2  ;;  %p55_p6 = scmp.ne.s32.totalorder %s1709_s29, %s1705_s28 }
  0x47   : > { %p56_p10 = scmp.eq.s32.totalorder %s1721_s10, 0  ;;  %p1422_p3 = scmp.lt.s32.totalorder %s1721_s10, 2 }
  0x48   : > { %s2235_s23 = smov (%p43_p13, %s41_s23), 0  ;;  %p1926_p7 = por %p1830_p2, %p55_p6 }
  0x49   : > { %p57_p5 = por %p56_p10, %p55_p6  ;;  %s45_s25 = ssub.s32 %s1717_s9, %s2235_s23 }
  0x4a   : > { %s2218_s20 = scalar_select %p1926_p7, 1, 0 }
  0x4b   : > { %s303_s26 = sand.u32 1, %s1709_s29   ;;  %p46_p9 = scmp.eq.s32.totalorder %s45_s25, 0 }
  0x4c   : > { %s1258_s22 = sshll.u32 %s303_s26, 3  ;;  %s1259_s11 = sshll.u32 %s1717_s9, 7 }
  0x4d   : > { %s1935_s12 = scalar_select %p46_p9, %s1709_s29, %s48_s24  }
  0x4e   : > { %s2219_s0 = sld [smem:[#allocation21_spill]]  ;;  %s307_s14 = scalar_lea.vmem [#allocation6], %s1258_s22 }
  0x4f   : > { %s314_s27 = sshll.u32 %s307_s14, 4  ;;  %p1944_p2 = pnand %p1422_p3, %p57_p5  ;;  %s1948_s27 = int_to_ptr.vmem [resolvable:$true] %s314_s27 }
  0x50   : > { %s304_s16 = scalar_lea.sflag [#allocation7], %s303_s26 }
  0x51   : > { %p1575_p12 = pneg %p1944_p2 }
  0x54   : > { %s1940_s19 = scalar_lea.hbm %s2219_s0, %s1259_s11  ;;  %s1578_s11 = scalar_lea.hbm %s2219_s0, 256 }
  0x55   : > { %s1573_s24 = scalar_lea.hbm %s1940_s19, 128  ;;  %p1579_p4 = scmp.lt.u32.totalorder %s1940_s19, %s2219_s0 }
  0x56   : > { %p1574_p11 = scmp.ne.s32.totalorder %s1940_s19, %s1573_s24  ;;  %p1580_p13 = scmp.lt.u32.totalorder %s1578_s11, %s1573_s24 }
  0x57   : > { %p1582_p10 = scmp.lt.u32.totalorder %s1573_s24, %s1940_s19 }
  0x58   : > { %p1576_p0 = pnand %p1575_p12, %p1574_p11  ;;  %p1581_p6 = por %p1580_p13, %p1579_p4 }
  0x5a   : > { %p1577_p1 = pneg %p1576_p0  ;;  %p1583_p3 = por %p1582_p10, %p1581_p6 }
  0x5c   : > { %p1584_p5 = pnand %p1583_p3, %p1577_p1 }
  0x5e   : > { %1587 = shalt.err (!%p1584_p5)
}
  0x5f   : > { %s1588_s26 = scalar_lea.vmem %s1948_s27, 128  ;;  %s1727_s14 = smov [#allocation6]  }
  0x60   : > { %p1589_p9 = scmp.ne.s32.totalorder %s1948_s27, %s1588_s26  ;;  %s1593_s25 = sshll.u32 %s1727_s14, 4  ;;  %s1594_s25 = int_to_ptr.vmem [resolvable:$false] %s1593_s25 }
  0x61   : > { %s1595_s22 = scalar_lea.vmem %s1594_s25, 256  ;;  %p1596_p7 = scmp.lt.s32.totalorder %s1948_s27, %s1594_s25 }
  0x62   : > { %p1591_p11 = pnand %p1589_p9, %p1575_p12  ;;  %p1597_p4 = scmp.lt.s32.totalorder %s1595_s22, %s1588_s26 }
  0x64   : > { %p1592_p0 = pneg %p1591_p11  ;;  %p1598_p13 = por %p1597_p4, %p1596_p7 }
  0x66   : > { %p1599_p6 = pnand %p1598_p13, %p1592_p0 }
  0x68   : > { %1602 = shalt.err (!%p1599_p6)
}
  0x69   : > { %1412 = dma.hbm_to_vmem [thread:$0]  (!%p1944_p2), %s1940_s19, 128, %s1948_s27, %s304_s16  }
  0x6a   : > { %323 = sbr.rel (%p1846_p8) target bundleno = 1894 (0x766), region = 48  ;;  %s1978_s24 = sand.u32 (!%p1846_p8), 1, %s1705_s28  }
  0x6b   : > { %s1261_s11 = sshll.u32 (!%p1846_p8), %s1978_s24, 3  ;;  %s326_s18 = scalar_lea.sflag (!%p1846_p8), [#allocation7], %s1978_s24 }
  0x6c   : > { %s329_s21 = scalar_lea.vmem (!%p1846_p8), [#allocation6], %s1261_s11  ;;  %p2221_p7 = scmp.ne.s32.totalorder (!%p1846_p8), %s2213_s15, 0 }
  0x71   : > { %1684 = dma.done.wait (%p2221_p7), %s326_s18, 128  }
  0x72   : > { %1686 = vsyncadd (%p2221_p7), %s326_s18, 4294967168  ;;  %p2222_p2 = scmp.ne.s32.totalorder %s2211_s13, 0 }
  0x74   : > { %1688 = dma.done.wait (%p2222_p2), [#allocation10], 272  }
  0x75   : > { %1690 = vsyncadd (%p2222_p2), [#allocation10], 4294967024  ;;  %vm381_vm0 = vcmask 261120   ;;  %v380_v0 = vld [vmem:[%s329_s21] sm:$0xff]  ;;  %v1495_v7 = vld [vmem:[#allocation9] sm:$0xff]   ;;  %v1728_v8 = vmov 0.0  }
  0x76   : > { %v382_v1 = vsel %vm381_vm0, %v380_v0, 0.0  ;;  %1324 = vmatprep.subr.bf16.mxu0 %v1728_v8  ;;  %vm1729_vm1 = vmmov 0   ;;  %v1496_v9 = vld [vmem:[#allocation9 + $0x8] sm:$0xff]   ;;  %1332 = vmatprep.subr.bf16.mxu1 %v1728_v8  ;;  %v1266_v14 = vld [vmem:[%s2193_s1] ss:$0 sm:$0xff]  ;;  %vm481_vm2 = vcmask 60416  }
  0x77   : > { %383 = vadd.xlane.f32.xlu0 %v382_v1  ;;  %1328 = vmatprep.mubr.msk.bf16.mxu0 %vm1729_vm1, %v1728_v8  ;;  %v1267_v16 = vld [vmem:[%s2194_s2] ss:$0 sm:$0xff]  ;;  %v1268_v20 = vld [vmem:[#allocation11] ss:$0 sm:$0xff]  ;;  %s1730_s27 = smov 80   ;;  %s1731_s7 = smov 96  }
  0x78   : > { %1325 = vmatpush3.bf16.msra.mxu0 %v1495_v7  ;;  %1334 = vmatprep.mubr.msk.bf16.mxu1 %vm1729_vm1, %v1728_v8  ;;  %s1732_s16 = smov 88   ;;  %s1733_s26 = smov 72   ;;  %vm556_vm3 = vcmask 64512   ;;  %vm800_vm4 = vcmask 1043456   ;;  %vm992_vm5 = vcmask 126016   ;;  %vm1001_vm6 = vcmask 191616  }
  0x79   : > { %1326 = vmatprep.subr.bf16.mxu0 %v1728_v8  ;;  %s1734_s14 = smov 120   ;;  %s1735_s25 = smov 112   ;;  %vm1010_vm7 = vcmask 257216  }
  0x7a   : > { %s1736_s22 = smov 104   ;;  %s1737_s18 = smov 64  }
  0x7b   : > { %s1738_s21 = smov 48   ;;  %s1739_s13 = smov 40  }
  0x7c   : > { %1327 = vmatpush3.bf16.msra.mxu0 %v1496_v9  ;;  %s1740_s15 = smov 56   ;;  %s1265_s17 = sshll.u32 %s1978_s24, 5 }
  0x7d   : > { %1338 = vmatprep.subr.bf16.mxu0 %v1728_v8  ;;  %s2062_s19 = scalar_lea.vmem [#allocation13], %s1265_s17  ;;  %p2223_p12 = scmp.ne.s32.totalorder %s2218_s20, 0 }
 0x104   : > { %v384_v2 = vpop.xlane.xlu0 %383 }
 0x105   : > { %v386_v3 = vmul.f32 0.03125, %v384_v2 }
 0x107   : > { %v387_v4 = vsub.f32 %v380_v0, %v386_v3 }
 0x109   : > { %v388_v5 = vmul.f32 %v387_v4, %v387_v4 }
 0x10b   : > { %v389_v6 = vsel %vm381_vm0, %v388_v5, 0.0 }
 0x10c   : > { %390 = vadd.xlane.f32.xlu0 %v389_v6 }
 0x199   : > { %v391_v10 = vpop.xlane.xlu0 %390 }
 0x19a   : > { %v392_v11 = vmul.f32 0.03125, %v391_v10 }
 0x19c   : > { %v393_v12 = vadd.f32 1e-05, %v392_v11 }
 0x19e   : > { %1499 = vrsqrt.f32 %v393_v12 }
 0x1a8   : > { %v1500_v13 = vpop.eup %1499 }
 0x1a9   : > { %v395_v15 = vmul.f32 %v1500_v13, %v387_v4 }
 0x1ab   : > { %v403_v17 = vmul.f32 %v1266_v14, %v395_v15 }
 0x1ad   : > { %v411_v18 = vadd.f32 %v1267_v16, %v403_v17 }
 0x1af   : > { %v412_v19 = vpack.c.bf16 %v411_v18, %v411_v18 }
 0x1b1   : > { %1329 = vmatmul.mubr.msk.bf16.vlgmr.msra.gmra.mrb[0].mxu0 %vm381_vm0, %v412_v19 }
 0x1b2   : > { %1340 = vmatprep.mubr.msk.bf16.mxu0 %vm1729_vm1, %v1728_v8 }
 0x284   : > { %v473_v21 = vpop.f32.mrb[0].mxu0 }
 0x285   : > { %v474_v22 = vadd.f32 %v1268_v20, %v473_v21  ;;  %v1330_v23 = vpop.f32.mrb[1].mxu0 }
 0x286   : > { %v476_v24 = vpop.f32.mrb[2].mxu0 }
 0x287   : > { %v479_v25 = vmul.f32 0.35355338, %v474_v22  ;;  %v2011_v26 = vpack.c.bf16 %v474_v22, %v474_v22  ;;  %v1331_v27 = vpop.f32.mrb[3].mxu0 }
 0x289   : > { %v480_v28 = vpack.c.bf16 %v479_v25, %v479_v25  ;;  %518 = vrot.lane.b32.xlu0 %v2011_v26, %s1730_s27  ;;  %487 = vrot.lane.b32.xlu1 %v2011_v26, %s1731_s7  ;;  %s1087_s27 = scalar_lea.sflag [#allocation14], %s1978_s24 }
 0x28b   : > { %482 = vst.msk [vmem:[#allocation2] sm:$0xf] %vm481_vm2, %v480_v28 }
 0x28d   : > { %503 = vrot.lane.b32.xlu1 %v2011_v26, %s1732_s16  ;;  %s1741_s16 = smov 16  }
 0x291   : > { %533 = vrot.lane.b32.xlu1 %v2011_v26, %s1733_s26 }
 0x292   : > { %v548_v40 = vld [vmem:[#allocation2] sm:$0xf] }
 0x295   : > { %498 = vrot.lane.b32.xlu1 %v480_v28, %s1734_s14 }
 0x299   : > { %513 = vrot.lane.b32.xlu1 %v480_v28, %s1735_s25  ;;  %s1742_s25 = smov 8  }
 0x29d   : > { %528 = vrot.lane.b32.xlu1 %v480_v28, %s1736_s22  ;;  %s1743_s22 = smov 24  }
 0x2fb   : > { %v519_v29 = vpop.permute.xlu0 %518  ;;  %v488_v30 = vpop.permute.xlu1 %487 }
 0x2fc   : > { %522 = vst.msk [vmem:[#allocation3 + $0x8] sm:$0xf] %vm481_vm2, %v519_v29  ;;  %490 = vst.msk [vmem:[#allocation3] sm:$0xf] %vm481_vm2, %v488_v30 }
 0x2ff   : > { %v504_v31 = vpop.permute.xlu1 %503 }
 0x300   : > { %507 = vst.msk [vmem:[#allocation3 + $0x4] sm:$0xf] %vm481_vm2, %v504_v31 }
 0x303   : > { %v534_v32 = vpop.permute.xlu1 %533  ;;  %v552_v33 = vld [vmem:[#allocation3] sm:$0xf]  ;;  %v554_v38 = vld [vmem:[#allocation3 + $0x8] sm:$0xf] }
 0x304   : > { %537 = vst.msk [vmem:[#allocation3 + $0xc] sm:$0xf] %vm481_vm2, %v534_v32  ;;  %v561_v34 = vsel %vm556_vm3, %v552_v33, 0  ;;  %v653_v41 = vsel %vm556_vm3, %v554_v38, 0 }
 0x305   : > { %1333 = vmatpush3.bf16.xpose.msra.mxu1 %v561_v34 }
 0x306   : > { %1344 = vmatprep.subr.bf16.mxu1 %v1728_v8 }
 0x307   : > { %v499_v35 = vpop.permute.xlu1 %498  ;;  %v553_v36 = vld [vmem:[#allocation3 + $0x4] sm:$0xf] }
 0x308   : > { %502 = vst.msk [vmem:[#allocation2 + $0x4] sm:$0xf] %vm481_vm2, %v499_v35  ;;  %v607_v37 = vsel %vm556_vm3, %v553_v36, 0 }
 0x309   : > { %1339 = vmatpush3.bf16.xpose.msra.mxu0 %v607_v37 }
 0x30a   : > { %1350 = vmatprep.subr.bf16.mxu0 %v1728_v8 }
 0x30b   : > { %v514_v39 = vpop.permute.xlu1 %513  ;;  %v555_v42 = vld [vmem:[#allocation3 + $0xc] sm:$0xf] }
 0x30c   : > { %517 = vst.msk [vmem:[#allocation2 + $0x8] sm:$0xf] %vm481_vm2, %v514_v39  ;;  %1335 = vmatmul.mubr.msk.bf16.vlgmr.msra.gmra.mrb[0].mxu1 %vm556_vm3, %v548_v40  ;;  %v699_v45 = vsel %vm556_vm3, %v555_v42, 0 }
 0x30d   : > { %1345 = vmatpush3.bf16.xpose.msra.mxu1 %v653_v41  ;;  %1346 = vmatprep.mubr.msk.bf16.mxu1 %vm1729_vm1, %v1728_v8 }
 0x30e   : > { %1356 = vmatprep.subr.bf16.mxu1 %v1728_v8 }
 0x30f   : > { %v529_v43 = vpop.permute.xlu1 %528  ;;  %v549_v44 = vld [vmem:[#allocation2 + $0x4] sm:$0xf] }
 0x310   : > { %532 = vst.msk [vmem:[#allocation2 + $0xc] sm:$0xf] %vm481_vm2, %v529_v43  ;;  %1341 = vmatmul.mubr.msk.bf16.vlgmr.msra.gmra.mrb[4].mxu0 %vm556_vm3, %v549_v44 }
 0x311   : > { %1351 = vmatpush3.bf16.xpose.msra.mxu0 %v699_v45  ;;  %1352 = vmatprep.mubr.msk.bf16.mxu0 %vm1729_vm1, %v1728_v8 }
 0x312   : > { %1362 = vmatprep.subr.bf16.mxu0 %v1728_v8 }
 0x313   : > { %v550_v46 = vld [vmem:[#allocation2 + $0x8] sm:$0xf] }
 0x314   : > { %1347 = vmatmul.mubr.msk.bf16.vlgmr.msra.gmra.mrb[4].mxu1 %vm556_vm3, %v550_v46 }
 0x315   : > { %1358 = vmatprep.mubr.msk.bf16.mxu1 %vm1729_vm1, %v1728_v8 }
 0x317   : > { %v551_v47 = vld [vmem:[#allocation2 + $0xc] sm:$0xf] }
 0x318   : > { %1353 = vmatmul.mubr.msk.bf16.vlgmr.msra.gmra.mrb[8].mxu0 %vm556_vm3, %v551_v47 }
 0x319   : > { %1364 = vmatprep.mubr.msk.bf16.mxu0 %vm1729_vm1, %v1728_v8 }
 0x3df   : > { %v597_v48 = vpop.f32.mrb[0].mxu1 }
 0x3e0   : > { %v1336_v49 = vpop.f32.mrb[1].mxu1  ;;  %v741_v50 = vsel %vm556_vm3, %v597_v48, -inf }
 0x3e1   : > { %742 = vmax.xlane.f32.xlu1 %v741_v50  ;;  %v600_v51 = vpop.f32.mrb[2].mxu1 }
 0x3e2   : > { %v1337_v52 = vpop.f32.mrb[3].mxu1 }
 0x3e3   : > { %v643_v53 = vpop.f32.mrb[4].mxu0 }
 0x3e4   : > { %v1342_v54 = vpop.f32.mrb[5].mxu0  ;;  %v744_v55 = vsel %vm556_vm3, %v643_v53, -inf }
 0x3e5   : > { %745 = vmax.xlane.f32.xlu0 %v744_v55  ;;  %v646_v56 = vpop.f32.mrb[6].mxu0 }
 0x3e6   : > { %v1343_v57 = vpop.f32.mrb[7].mxu0 }
 0x3e7   : > { %v689_v58 = vpop.f32.mrb[4].mxu1 }
 0x3e8   : > { %v1348_v59 = vpop.f32.mrb[5].mxu1  ;;  %v747_v60 = vsel %vm556_vm3, %v689_v58, -inf }
 0x3e9   : > { %748 = vmax.xlane.f32.xlu1 %v747_v60  ;;  %v692_v61 = vpop.f32.mrb[6].mxu1 }
 0x3ea   : > { %v1349_v62 = vpop.f32.mrb[7].mxu1  ;;  %v1497_v61 = vld [vmem:[%s2197_s5] sm:$0xff]  }
 0x3eb   : > { %v735_v63 = vpop.f32.mrb[8].mxu0 }
 0x3ec   : > { %v1354_v0 = vpop.f32.mrb[9].mxu0  ;;  %v750_v1 = vsel %vm556_vm3, %v735_v63, -inf }
 0x3ed   : > { %751 = vmax.xlane.f32.xlu0 %v750_v1  ;;  %v738_v2 = vpop.f32.mrb[10].mxu0  ;;  %v1498_v0 = vld [vmem:[%s2197_s5 + $0x8] sm:$0xff]  }
 0x3ee   : > { %v1355_v3 = vpop.f32.mrb[11].mxu0 }
 0x3fa   : > { %491 = vrot.lane.b32.xlu1 %v2011_v26, %s1737_s18  ;;  %s1301_s18 = sshll.u32 %s1713_s30, 9 }
 0x3fb   : > { %s2104_s17 = scalar_lea.hbm %s2200_s8, %s1301_s18 }
 0x46e   : > { %v743_v4 = vpop.xlane.xlu1 %742 }
 0x46f   : > { %v753_v5 = vsub.f32 %v597_v48, %v743_v4 }
 0x471   : > { %v757_v6 = vmul.f32 1.442695, %v753_v5 }
 0x472   : > { %v746_v7 = vpop.xlane.xlu0 %745 }
 0x473   : > { %1501 = vpow2.f32 %v757_v6  ;;  %v754_v9 = vsub.f32 %v643_v53, %v746_v7 }
 0x475   : > { %v759_v10 = vmul.f32 1.442695, %v754_v9 }
 0x476   : > { %v749_v11 = vpop.xlane.xlu1 %748 }
 0x477   : > { %1503 = vpow2.f32 %v759_v10  ;;  %v755_v12 = vsub.f32 %v689_v58, %v749_v11 }
 0x479   : > { %v761_v13 = vmul.f32 1.442695, %v755_v12 }
 0x47a   : > { %v492_v14 = vpop.permute.xlu1 %491  ;;  %v752_v15 = vpop.xlane.xlu0 %751 }
 0x47b   : > { %1505 = vpow2.f32 %v761_v13  ;;  %494 = vst.msk [vmem:[#allocation4] sm:$0xf] %vm481_vm2, %v492_v14  ;;  %v756_v16 = vsub.f32 %v735_v63, %v752_v15 }
 0x47d   : > { %v1502_v17 = vpop.eup %1501  ;;  %v763_v18 = vmul.f32 1.442695, %v756_v16 }
 0x47e   : > { %v765_v19 = vsel %vm556_vm3, %v1502_v17, 0.0 }
 0x47f   : > { %1507 = vpow2.f32 %v763_v18  ;;  %766 = vadd.xlane.f32.xlu1 %v765_v19 }
 0x481   : > { %v1504_v20 = vpop.eup %1503 }
 0x482   : > { %v768_v21 = vsel %vm556_vm3, %v1504_v20, 0.0  ;;  %v793_v22 = vld [vmem:[#allocation4] sm:$0xf] }
 0x483   : > { %769 = vadd.xlane.f32.xlu0 %v768_v21  ;;  %v802_v23 = vsel %vm800_vm4, %v793_v22, 0 }
 0x484   : > { %1357 = vmatpush3.bf16.msra.mxu1 %v802_v23 }
 0x485   : > { %v1506_v24 = vpop.eup %1505  ;;  %1368 = vmatprep.subr.bf16.mxu1 %v1728_v8 }
 0x486   : > { %v771_v25 = vsel %vm556_vm3, %v1506_v24, 0.0 }
 0x487   : > { %772 = vadd.xlane.f32.xlu1 %v771_v25 }
 0x489   : > { %v1508_v27 = vpop.eup %1507 }
 0x48a   : > { %v774_v28 = vsel %vm556_vm3, %v1508_v27, 0.0 }
 0x48b   : > { %775 = vadd.xlane.f32.xlu0 %v774_v28 }
 0x498   : > { %523 = vrot.lane.b32.xlu1 %v2011_v26, %s1738_s21  ;;  %s1115_s21 = sshll.u32 %s2062_s19, 4  ;;  %s2106_s21 = int_to_ptr.vmem [resolvable:$true] %s1115_s21 }
 0x499   : > { %s1603_s7 = scalar_lea.vmem %s2106_s21, 512 }
 0x49a   : > { %p1604_p8 = scmp.ne.s32.totalorder %s2106_s21, %s1603_s7 }
 0x49c   : > { %538 = vrot.lane.b32.xlu1 %v2011_v26, %s1739_s13  ;;  %p1605_p1 = pnand %p1604_p8, %p2223_p12 }
 0x49e   : > { %p1606_p10 = pneg %p1605_p1 }
 0x4a1   : > { %508 = vrot.lane.b32.xlu0 %v2011_v26, %s1740_s15 }
 0x50c   : > { %v767_v29 = vpop.xlane.xlu1 %766 }
 0x50d   : > { %1509 = vrcp.f32 %v767_v29 }
 0x510   : > { %v770_v30 = vpop.xlane.xlu0 %769 }
 0x511   : > { %1511 = vrcp.f32 %v770_v30 }
 0x514   : > { %v773_v31 = vpop.xlane.xlu1 %772 }
 0x515   : > { %1513 = vrcp.f32 %v773_v31 }
 0x517   : > { %v1510_v32 = vpop.eup %1509 }
 0x518   : > { %v778_v33 = vmul.f32 %v1510_v32, %v1502_v17  ;;  %v524_v34 = vpop.permute.xlu1 %523  ;;  %v776_v35 = vpop.xlane.xlu0 %775 }
 0x519   : > { %527 = vst.msk [vmem:[#allocation4 + $0x8] sm:$0xf] %vm481_vm2, %v524_v34  ;;  %1515 = vrcp.f32 %v776_v35 }
 0x51a   : > { %785 = vst.msk [vmem:[%s2062_s19] sm:$0xff] %vm556_vm3, %v778_v33  ;;  %v789_v26 = vpack.c.bf16 %v778_v33, %v778_v33 }
 0x51b   : > { %v1512_v36 = vpop.eup %1511 }
 0x51c   : > { %v780_v37 = vmul.f32 %v1512_v36, %v1504_v20  ;;  %1359 = vmatmul.mubr.msk.bf16.vlgmr.msra.gmra.mrb[8].mxu1 %vm556_vm3, %v789_v26  ;;  %v539_v38 = vpop.permute.xlu1 %538  ;;  %v509_v39 = vpop.permute.xlu0 %508 }
 0x51d   : > { %542 = vst.msk [vmem:[#allocation4 + $0xc] sm:$0xf] %vm481_vm2, %v539_v38  ;;  %512 = vst.msk [vmem:[#allocation4 + $0x4] sm:$0xf] %vm481_vm2, %v509_v39  ;;  %1370 = vmatprep.mubr.msk.bf16.mxu1 %vm1729_vm1, %v1728_v8 }
 0x51e   : > { %786 = vst.msk [vmem:[%s2062_s19 + $0x8] sm:$0xff] %vm556_vm3, %v780_v37  ;;  %v790_v50 = vpack.c.bf16 %v780_v37, %v780_v37 }
 0x51f   : > { %v1514_v40 = vpop.eup %1513 }
 0x520   : > { %v782_v41 = vmul.f32 %v1514_v40, %v1506_v24  ;;  %v795_v42 = vld [vmem:[#allocation4 + $0x8] sm:$0xf] }
 0x521   : > { %v894_v43 = vsel %vm800_vm4, %v795_v42, 0 }
 0x522   : > { %787 = vst.msk [vmem:[%s2062_s19 + $0x10] sm:$0xff] %vm556_vm3, %v782_v41  ;;  %1369 = vmatpush3.bf16.msra.mxu1 %v894_v43  ;;  %v791_v44 = vpack.c.bf16 %v782_v41, %v782_v41 }
 0x523   : > { %v1516_v45 = vpop.eup %1515  ;;  %1380 = vmatprep.subr.bf16.mxu1 %v1728_v8 }
 0x524   : > { %v784_v46 = vmul.f32 %v1516_v45, %v1508_v27  ;;  %v794_v47 = vld [vmem:[#allocation4 + $0x4] sm:$0xf]  ;;  %v796_v49 = vld [vmem:[#allocation4 + $0xc] sm:$0xf] }
 0x525   : > { %1371 = vmatmul.mubr.msk.bf16.vlgmr.msra.gmra.mrb[12].mxu1 %vm556_vm3, %v791_v44  ;;  %v848_v48 = vsel %vm800_vm4, %v794_v47, 0  ;;  %v940_v51 = vsel %vm800_vm4, %v796_v49, 0 }
 0x526   : > { %788 = vst.msk [vmem:[%s2062_s19 + $0x18] sm:$0xff] %vm556_vm3, %v784_v46  ;;  %1363 = vmatpush3.bf16.msra.mxu0 %v848_v48  ;;  %1384 = vmatprep.mubr.msk.bf16.mxu1 %vm1729_vm1, %v1728_v8  ;;  %v792_v52 = vpack.c.bf16 %v784_v46, %v784_v46 }
 0x527   : > { %1374 = vmatprep.subr.bf16.mxu0 %v1728_v8  ;;  %1381 = vmatpush3.bf16.msra.mxu1 %v1497_v61 }
 0x528   : > { %1382 = vmatprep.subr.bf16.mxu1 %v1728_v8 }
 0x529   : > { %1365 = vmatmul.mubr.msk.bf16.vlgmr.msra.gmra.mrb[12].mxu0 %vm556_vm3, %v790_v50 }
 0x52a   : > { %1375 = vmatpush3.bf16.msra.mxu0 %v940_v51  ;;  %1376 = vmatprep.mubr.msk.bf16.mxu0 %vm1729_vm1, %v1728_v8 }
 0x52b   : > { %1383 = vmatpush3.bf16.msra.mxu1 %v1498_v0 }
 0x531   : > { %1377 = vmatmul.mubr.msk.bf16.vlgmr.msra.gmra.mrb[16].mxu0 %vm556_vm3, %v792_v52 }
 0x5ef   : > { %v838_v53 = vpop.f32.mrb[8].mxu1 }
 0x5f0   : > { %v982_v54 = vpack.c.bf16 %v838_v53, %v838_v53  ;;  %v1360_v55 = vpop.f32.mrb[9].mxu1 }
 0x5f1   : > { %v841_v56 = vpop.f32.mrb[10].mxu1 }
 0x5f2   : > { %984 = vst.msk [vmem:[#allocation5] sm:$0xf] %vm481_vm2, %v982_v54  ;;  %v1361_v57 = vpop.f32.mrb[11].mxu1 }
 0x5f8   : > { %v930_v58 = vpop.f32.mrb[12].mxu1 }
 0x5f9   : > { %v1299_v59 = vpack.c.bf16 %v930_v58, %v930_v58  ;;  %v1372_v60 = vpop.f32.mrb[13].mxu1 }
 0x5fa   : > { %v933_v62 = vpop.f32.mrb[14].mxu1 }
 0x5fb   : > { %998 = vrot.lane.b32.xlu1 %v1299_v59, %s1741_s16  ;;  %v1373_v63 = vpop.f32.mrb[15].mxu1  ;;  %s1744_s16 = smov [#allocation13]  }
 0x5fc   : > { %v884_v1 = vpop.f32.mrb[12].mxu0  ;;  %s1607_s26 = sshll.u32 %s1744_s16, 4  ;;  %s1608_s26 = int_to_ptr.vmem [resolvable:$false] %s1607_s26 }
 0x5fd   : > { %v1298_v2 = vpack.c.bf16 %v884_v1, %v884_v1  ;;  %v1366_v3 = vpop.f32.mrb[13].mxu0  ;;  %s1609_s19 = scalar_lea.vmem %s1608_s26, 1024  ;;  %p1610_p3 = scmp.lt.s32.totalorder %s2106_s21, %s1608_s26 }
 0x5fe   : > { %v887_v4 = vpop.f32.mrb[14].mxu0  ;;  %p1611_p5 = scmp.lt.s32.totalorder %s1609_s19, %s1603_s7 }
 0x5ff   : > { %989 = vrot.lane.b32.xlu0 %v1298_v2, %s1742_s25  ;;  %v1367_v5 = vpop.f32.mrb[15].mxu0 }
 0x600   : > { %p1612_p9 = por %p1611_p5, %p1610_p3 }
 0x602   : > { %p1613_p11 = pnand %p1612_p9, %p1606_p10 }
 0x604   : > { %v976_v6 = vpop.f32.mrb[16].mxu0 }
 0x605   : > { %v1300_v7 = vpack.c.bf16 %v976_v6, %v976_v6  ;;  %v1378_v9 = vpop.f32.mrb[17].mxu0 }
 0x606   : > { %v979_v10 = vpop.f32.mrb[18].mxu0 }
 0x607   : > { %1007 = vrot.lane.b32.xlu0 %v1300_v7, %s1743_s22  ;;  %v1379_v11 = vpop.f32.mrb[19].mxu0 }
 0x66d   : > { %v999_v12 = vpop.permute.xlu1 %998 }
 0x671   : > { %v990_v8 = vpop.permute.xlu0 %989 }
 0x672   : > { %993 = vst.msk [vmem:[#allocation5] sm:$0xf] %vm992_vm5, %v990_v8 }
 0x673   : > { %1002 = vst.msk [vmem:[#allocation5] sm:$0xf] %vm1001_vm6, %v999_v12 }
 0x679   : > { %v1008_v13 = vpop.permute.xlu0 %1007 }
 0x67a   : > { %1011 = vst.msk [vmem:[#allocation5] sm:$0xf] %vm1010_vm7, %v1008_v13 }
 0x681   : > { %v1012_v14 = vld [vmem:[#allocation5] sm:$0xf] }
 0x682   : > { %1385 = vmatmul.mubr.msk.bf16.vlgmr.msra.gmra.mrb[16].mxu1 %vm381_vm0, %v1012_v14 }
 0x683   : > { %1616 = shalt.err (!%p1613_p11)
}
 0x684   : > { %s1617_s14 = scalar_lea.hbm %s2104_s17, 512  ;;  %s1621_s13 = scalar_lea.hbm %s2200_s8, 1024 }
 0x685   : > { %p1618_p0 = scmp.ne.s32.totalorder %s2104_s17, %s1617_s14  ;;  %p1622_p6 = scmp.lt.u32.totalorder %s2104_s17, %s2200_s8 }
 0x686   : > { %p1623_p7 = scmp.lt.u32.totalorder %s1621_s13, %s1617_s14  ;;  %p1625_p8 = scmp.lt.u32.totalorder %s1617_s14, %s2104_s17 }
 0x687   : > { %p1619_p4 = pnand %p1618_p0, %p2223_p12 }
 0x688   : > { %p1624_p2 = por %p1623_p7, %p1622_p6 }
 0x689   : > { %p1620_p13 = pneg %p1619_p4 }
 0x68a   : > { %p1626_p1 = por %p1625_p8, %p1624_p2 }
 0x68c   : > { %p1627_p10 = pnand %p1626_p1, %p1620_p13 }
 0x68e   : > { %1630 = shalt.err (!%p1627_p10)
}
 0x68f   : > { %s1745_s7 = smov 128   ;;  %v1285_v15 = vld [vmem:[%s2198_s6] ss:$0 sm:$0xff]  ;;  %s1291_s14 = sshll.u32 %s1713_s30, 7 }
 0x690   : > { %1399 = dma.vmem_to_hbm [thread:$0]  (%p2223_p12), %s2106_s21, 512, %s2104_s17, %s1087_s27, %s1745_s7, %s1745_s7, %s1742_s25  }
 0x691   : > { %s367_s22 = scalar_lea.vmem [#allocation12], %s1261_s11  ;;  %s2224_s16 = sld [smem:[#allocation22_spill]] }
 0x692   : > { %s1101_s18 = sshll.u32 %s367_s22, 4  ;;  %s1082_s30 = scalar_lea.sflag [#allocation8], %s1978_s24  ;;  %s2144_s18 = int_to_ptr.vmem [resolvable:$true] %s1101_s18 }
 0x693   : > { %s1631_s11 = scalar_lea.vmem %s2144_s18, 128  ;;  %s1746_s25 = smov [#allocation12]  }
 0x694   : > { %p1632_p3 = scmp.ne.s32.totalorder %s2144_s18, %s1631_s11  ;;  %s1635_s21 = sshll.u32 %s1746_s25, 4  ;;  %s1636_s21 = int_to_ptr.vmem [resolvable:$false] %s1635_s21 }
 0x695   : > { %s1637_s17 = scalar_lea.vmem %s1636_s21, 256  ;;  %p1638_p11 = scmp.lt.s32.totalorder %s2144_s18, %s1636_s21 }
 0x696   : > { %p1633_p5 = pnand %p1632_p3, %p2223_p12  ;;  %p1639_p0 = scmp.lt.s32.totalorder %s1637_s17, %s1631_s11 }
 0x697   : > { %s2142_s0 = scalar_lea.hbm %s2224_s16, %s1291_s14 }
 0x698   : > { %p1634_p9 = pneg %p1633_p5  ;;  %p1640_p4 = por %p1639_p0, %p1638_p11 }
 0x69a   : > { %p1641_p13 = pnand %p1640_p4, %p1634_p9 }
 0x755   : > { %v1074_v16 = vpop.f32.mrb[16].mxu1 }
 0x756   : > { %v1075_v17 = vadd.f32 %v1285_v15, %v1074_v16  ;;  %v1386_v18 = vpop.f32.mrb[17].mxu1 }
 0x757   : > { %v1077_v19 = vpop.f32.mrb[18].mxu1 }
 0x758   : > { %v1387_v20 = vpop.f32.mrb[19].mxu1  ;;  %1080 = vst.msk [vmem:[%s367_s22] sm:$0xff] %vm381_vm0, %v1075_v17 }
 0x759   : > { %1644 = shalt.err (!%p1641_p13)
}
 0x75a   : > { %s1645_s24 = scalar_lea.hbm %s2142_s0, 128  ;;  %s1649_s26 = scalar_lea.hbm %s2224_s16, 256 }
 0x75b   : > { %p1646_p6 = scmp.ne.s32.totalorder %s2142_s0, %s1645_s24  ;;  %p1650_p8 = scmp.lt.u32.totalorder %s2142_s0, %s2224_s16 }
 0x75c   : > { %p1651_p1 = scmp.lt.u32.totalorder %s1649_s26, %s1645_s24  ;;  %p1653_p3 = scmp.lt.u32.totalorder %s1645_s24, %s2142_s0 }
 0x75d   : > { %p1647_p7 = pnand %p1646_p6, %p2223_p12 }
 0x75e   : > { %p1652_p10 = por %p1651_p1, %p1650_p8 }
 0x75f   : > { %p1648_p2 = pneg %p1647_p7 }
 0x760   : > { %p1654_p5 = por %p1653_p3, %p1652_p10 }
 0x762   : > { %p1655_p9 = pnand %p1654_p5, %p1648_p2 }
 0x764   : > { %1658 = shalt.err (!%p1655_p9)
}
 0x765   : > { %1398 = dma.vmem_to_hbm [thread:$0]  (%p2223_p12), %s2144_s18, 128, %s2142_s0, %s1082_s30  }
 0x766 PF: > { %s2225_s22 = sld [smem:[#allocation19_spill]]  ;;  %s2226_s13 = sld [smem:[#allocation20_spill]] }
 0x767   : > { %p2228_p0 = scmp.ge.s32.totalorder %s1721_s10, 2 }
 0x76c   : > { %s1130_s15 = sand.u32 1, %s2225_s22   ;;  %p2227_p11 = scmp.ne.s32.totalorder %s2226_s13, 0 }
 0x76d   : > { %s1131_s11 = scalar_lea.sflag [#allocation8], %s1130_s15 }
 0x76e   : > { %p1414_p4 = pnand %p2228_p0, %p2227_p11 }
 0x770   : > { %1692 = dma.done.wait (!%p1414_p4), %s1131_s11, 128  }
 0x771   : > { %1694 = vsyncadd (!%p1414_p4), %s1131_s11, 4294967168  ;;  %s1140_s25 = scalar_lea.sflag [#allocation14], %s1130_s15 }
 0x772   : > { %1696 = dma.done.wait (!%p1414_p4), %s1140_s25, 512  }
 0x773   : > { %1698 = vsyncadd (!%p1414_p4), %s1140_s25, 4294966784  ;;  %s29_s10 = sadd.s32 1, %s1721_s10   ;;  %s2229_s27 = smov %s1705_s28 }
 0x774   : > { %p26_p13 = scmp.ge.s32.totalorder %s29_s10, 4   ;;  %s2230_s28 = smov %s1709_s29 }
 0x775   : > { %s2231_s29 = smov %s1935_s12  ;;  %s2232_s30 = smov %s1717_s9 }
 0x776   : > { %s2233_s9 = smov %s2235_s23  ;;  %28 = sbr.rel (!%p26_p13) target bundleno = 12 (0xc), region = 132 }
 0x77d   :  { %1145 = vsyncpa [#allocation7], 1 }
 0x77e   :  { %1147 = vsyncpa [#allocation7 + $0x1], 1 }
 0x77f   :  { %1148 = vsyncpa [#allocation10], 1 }
 0x780   :  { %1149 = vsyncpa [#allocation8], 1 }
 0x781   :  { %1151 = vsyncpa [#allocation8 + $0x1], 1 }
 0x782   :  { %1152 = vsyncpa [#allocation14], 1 }
 0x783   :  { %1154 = vsyncpa [#allocation14 + $0x1], 1 }

</bundles_post_ra>
